<compile_context>
chip_gen: v5e
topology: v5e:2x2
jax: 0.10.0
libtpu: 0.0.40
codegen_flags: <defaults>
</compile_context>

<pallas_src>
import jax
import jax.numpy as jnp
from jax.experimental import pallas as pl
from jax.experimental.pallas import tpu as pltpu


# ----------------------------------------------------------------------------
# FeedForward: y = LeakyReLU(x @ W1.T + b1) @ W2.T + b2   (slope = 0.01)
# Computed lane-dense as y.T = W2 @ LeakyReLU(W1 @ x.T + b1) + b2.
# ----------------------------------------------------------------------------
def _feedforward_kernel(xT_ref, w1_ref, b1_ref, w2_ref, b2_ref, oT_ref):
    xT = xT_ref[...]          # (D, TN) compute dtype (bf16 default); rows on lanes
    w1 = w1_ref[...]          # (D, D)  PyTorch (out, in) layout, used directly
    w2 = w2_ref[...]
    h = jnp.dot(w1, xT, preferred_element_type=jnp.float32) + b1_ref[...]
    h = jnp.where(h >= 0, h, 0.01 * h)                 # LeakyReLU in f32 (v5e-safe)
    y = jnp.dot(w2, h.astype(w2.dtype),
                preferred_element_type=jnp.float32) + b2_ref[...]
    oT_ref[...] = y.astype(oT_ref.dtype)


def prepare_params(w1, b1, w2, b2, compute_dtype=jnp.bfloat16):
    """Call once outside the per-call path: cast weights for the MXU and shape
    biases as (D, 1) columns.  With the lane-dense (transposed-activation)
    kernel, y.T = W @ x.T + b, so PyTorch (out, in) weights need no transpose.
    Pass compute_dtype=jnp.float32 to keep full-precision matmul operands."""
    return (w1.astype(compute_dtype),
            b1.reshape(-1, 1).astype(jnp.float32),
            w2.astype(compute_dtype),
            b2.reshape(-1, 1).astype(jnp.float32))


def feedforward(x, params, *, tn=512):
    """x: (N, D) float32 rows; params from prepare_params(). Returns (N, D) f32.

    `tn` = rows per grid step (lane tile).  Larger tn (512-2048) amortizes the
    ~0.35 us per-step overhead for big N; it must be a multiple of 128."""
    N, D = x.shape
    w1, b1, w2, b2 = params
    n_tiles = pl.cdiv(N, tn)
    n_pad = n_tiles * tn

    # Lane-dense layout: put the large row axis on the 128-lane dimension.
    xT = x.T                                          # (D, N)
    if n_pad != N:
        xT = jnp.pad(xT, ((0, 0), (0, n_pad - N)))
    xT = xT.astype(w1.dtype)                          # bf16 operands, f32 accumulate

    cost = pl.CostEstimate(
        flops=int(2 * 2 * n_pad * D * D),
        transcendentals=0,
        bytes_accessed=int(xT.size * xT.dtype.itemsize          # x
                           + 2 * D * D * w1.dtype.itemsize      # weights
                           + 2 * D * 4                          # biases
                           + n_pad * D * 4),                    # output
    )

    outT = pl.pallas_call(
        _feedforward_kernel,
        out_shape=jax.ShapeDtypeStruct((D, n_pad), jnp.float32),
        grid_spec=pl.GridSpec(
            grid=(n_tiles,),                                   # tiled + pipelined rows
            in_specs=[
                pl.BlockSpec((D, tn), lambda i: (0, i)),       # x.T tile (rows on lanes)
                pl.BlockSpec((D, D), lambda i: (0, 0)),        # w1 resident across steps
                pl.BlockSpec((D, 1), lambda i: (0, 0)),        # b1 resident
                pl.BlockSpec((D, D), lambda i: (0, 0)),        # w2 resident
                pl.BlockSpec((D, 1), lambda i: (0, 0)),        # b2 resident
            ],
            out_specs=pl.BlockSpec((D, tn), lambda i: (0, i)),
        ),
        compiler_params=pltpu.CompilerParams(
            # Row tiles are independent: shardable across TensorCores (v7x).
            dimension_semantics=("parallel",)),
        cost_estimate=cost,
    )(xT, w1, b1, w2, b2)

    return outT[:, :N].T


# ----------------------------------------------------------------------------
# PiecesModel.forward: material balance per board (tensor-encoded boards).
# ----------------------------------------------------------------------------
def _points_balance_kernel(board_ref, o_ref):
    p = board_ref[...]                                # (B, 64) int32 signed piece codes
    ap = jnp.abs(p)
    val = jnp.where(ap == 1, 1.0,
          jnp.where(ap == 2, 3.0,
          jnp.where(ap == 3, 3.0,
          jnp.where(ap == 4, 5.0,
          jnp.where(ap == 5, 9.0, 0.0)))))            # empty / king -> 0
    sgn = jnp.where(p > 0, 1.0, jnp.where(p < 0, -1.0, 0.0))
    o_ref[...] = jnp.sum(sgn * val, axis=-1, keepdims=True)


def pieces_model_forward(boards):
    """boards: (B, 64) int32 signed piece codes. Returns (B,) f32 point balances."""
    B, S = boards.shape
    out = pl.pallas_call(
        _points_balance_kernel,
        out_shape=jax.ShapeDtypeStruct((B, 1), jnp.float32),
        grid_spec=pl.GridSpec(
            grid=(1,),
            in_specs=[pl.BlockSpec((B, S), lambda i: (0, 0))],
            out_specs=pl.BlockSpec((B, 1), lambda i: (0, 0)),
        ),
    )(boards.astype(jnp.int32))
    return out[:, 0]


def xavier_uniform(key, shape, gain):
    # PyTorch nn.init.xavier_uniform_ for a (fan_out, fan_in) Linear weight.
    fan_out, fan_in = shape
    bound = gain * (6.0 / (fan_in + fan_out)) ** 0.5
    return jax.random.uniform(key, shape, jnp.float32, minval=-bound, maxval=bound)


if __name__ == "__main__":
    key = jax.random.PRNGKey(0)
    k_board, k_x, k_w1, k_w2 = jax.random.split(key, 4)

    # ---- PiecesModel forward: points balance over encoded boards ----
    batch_boards = 4
    boards = jax.random.randint(k_board, (batch_boards, 64), -6, 7, dtype=jnp.int32)
    scores = pieces_model_forward(boards)
    jax.block_until_ready(scores)

    vals = jnp.array([0.0, 1.0, 3.0, 3.0, 5.0, 9.0, 0.0], jnp.float32)
    ref_scores = jnp.sum(jnp.sign(boards).astype(jnp.float32)
                         * vals[jnp.abs(boards)], axis=-1)
    assert scores.shape == (batch_boards,)
    assert jnp.allclose(scores, ref_scores, atol=1e-5)

    # ---- FeedForward (reviewed kernel), chess-ish shapes: 64 squares/board ----
    batch, seq, embed_dim = 8, 64, 32
    N = batch * seq                                   # 512 flattened rows
    x = jax.random.normal(k_x, (N, embed_dim), jnp.float32)
    w1 = xavier_uniform(k_w1, (embed_dim, embed_dim), gain=0.1)   # lin1.weight
    b1 = jnp.zeros((embed_dim,), jnp.float32)                     # lin1.bias
    w2 = xavier_uniform(k_w2, (embed_dim, embed_dim), gain=0.1)   # lin2.weight
    b2 = jnp.zeros((embed_dim,), jnp.float32)                     # lin2.bias

    params = prepare_params(w1, b1, w2, b2)           # once, outside per-call path
    # Small tile here so the example exercises several pipelined/parallel grid
    # steps; for large N leave tn at its larger default.
    out = feedforward(x, params, tn=128)
    jax.block_until_ready(out)

    # Pure-JAX f32 reference (kernel uses bf16 matmul operands, f32 accumulate).
    h_ref = x @ w1.T + b1
    h_ref = jnp.where(h_ref >= 0, h_ref, 0.01 * h_ref)
    ref = h_ref @ w2.T + b2
    assert out.shape == (N, embed_dim)
    assert jnp.allclose(out, ref, atol=2e-3, rtol=2e-2), \
        float(jnp.max(jnp.abs(out - ref)))

    print("KERNEL_OK")
</pallas_src>

<mosaic_0001>
module attributes {stable_mosaic.version = 11 : i64} {
  func.func @_points_balance_kernel(%arg0: i32, %arg1: memref<4x64xi32, #tpu.memory_space<vmem>>, %arg2: memref<4x1xf32, #tpu.memory_space<vmem>>) attributes {dimension_semantics = [#tpu.dimension_semantics<arbitrary>], iteration_bounds = array<i64: 1>, scalar_prefetch = 0 : i64, scratch_operands = 0 : i64, tpu.core_type = #tpu.core_type<tc>, window_params = [{pipeline_mode = #tpu.pipeline_mode<synchronous>, transform_indices = @transform_0, window_bounds = array<i64: 4, 64>}, {pipeline_mode = #tpu.pipeline_mode<synchronous>, transform_indices = @transform_1, window_bounds = array<i64: 4, 1>}]} {
    %c0 = arith.constant 0 : index
    %c0_0 = arith.constant 0 : index
    %0 = vector.load %arg1[%c0, %c0_0] : memref<4x64xi32, #tpu.memory_space<vmem>>, vector<4x64xi32>
    %1 = math.absi %0 : vector<4x64xi32>
    %c1_i32 = arith.constant 1 : i32
    %2 = vector.broadcast %c1_i32 : i32 to vector<4x64xi32>
    %3 = arith.cmpi eq, %1, %2 : vector<4x64xi32>
    %c2_i32 = arith.constant 2 : i32
    %4 = vector.broadcast %c2_i32 : i32 to vector<4x64xi32>
    %5 = arith.cmpi eq, %1, %4 : vector<4x64xi32>
    %c3_i32 = arith.constant 3 : i32
    %6 = vector.broadcast %c3_i32 : i32 to vector<4x64xi32>
    %7 = arith.cmpi eq, %1, %6 : vector<4x64xi32>
    %c4_i32 = arith.constant 4 : i32
    %8 = vector.broadcast %c4_i32 : i32 to vector<4x64xi32>
    %9 = arith.cmpi eq, %1, %8 : vector<4x64xi32>
    %c5_i32 = arith.constant 5 : i32
    %10 = vector.broadcast %c5_i32 : i32 to vector<4x64xi32>
    %11 = arith.cmpi eq, %1, %10 : vector<4x64xi32>
    %cst = arith.constant 9.000000e+00 : f32
    %cst_1 = arith.constant 0.000000e+00 : f32
    %12 = vector.broadcast %cst : f32 to vector<4x64xf32>
    %13 = vector.broadcast %cst_1 : f32 to vector<4x64xf32>
    %14 = arith.select %11, %12, %13 : vector<4x64xi1>, vector<4x64xf32>
    %cst_2 = arith.constant 5.000000e+00 : f32
    %15 = vector.broadcast %cst_2 : f32 to vector<4x64xf32>
    %16 = arith.select %9, %15, %14 : vector<4x64xi1>, vector<4x64xf32>
    %cst_3 = arith.constant 3.000000e+00 : f32
    %17 = vector.broadcast %cst_3 : f32 to vector<4x64xf32>
    %18 = arith.select %7, %17, %16 : vector<4x64xi1>, vector<4x64xf32>
    %cst_4 = arith.constant 3.000000e+00 : f32
    %19 = vector.broadcast %cst_4 : f32 to vector<4x64xf32>
    %20 = arith.select %5, %19, %18 : vector<4x64xi1>, vector<4x64xf32>
    %cst_5 = arith.constant 1.000000e+00 : f32
    %21 = vector.broadcast %cst_5 : f32 to vector<4x64xf32>
    %22 = arith.select %3, %21, %20 : vector<4x64xi1>, vector<4x64xf32>
    %c0_i32 = arith.constant 0 : i32
    %23 = vector.broadcast %c0_i32 : i32 to vector<4x64xi32>
    %24 = arith.cmpi sgt, %0, %23 : vector<4x64xi32>
    %c0_i32_6 = arith.constant 0 : i32
    %25 = vector.broadcast %c0_i32_6 : i32 to vector<4x64xi32>
    %26 = arith.cmpi slt, %0, %25 : vector<4x64xi32>
    %cst_7 = arith.constant -1.000000e+00 : f32
    %cst_8 = arith.constant 0.000000e+00 : f32
    %27 = vector.broadcast %cst_7 : f32 to vector<4x64xf32>
    %28 = vector.broadcast %cst_8 : f32 to vector<4x64xf32>
    %29 = arith.select %26, %27, %28 : vector<4x64xi1>, vector<4x64xf32>
    %cst_9 = arith.constant 1.000000e+00 : f32
    %30 = vector.broadcast %cst_9 : f32 to vector<4x64xf32>
    %31 = arith.select %24, %30, %29 : vector<4x64xi1>, vector<4x64xf32>
    %32 = arith.mulf %31, %22 : vector<4x64xf32>
    %cst_10 = arith.constant dense<0.000000e+00> : vector<4xf32>
    %33 = vector.multi_reduction <add>, %32, %cst_10 [1] : vector<4x64xf32> to vector<4xf32>
    %34 = vector.shape_cast %33 : vector<4xf32> to vector<4x1xf32>
    %c0_11 = arith.constant 0 : index
    %c0_12 = arith.constant 0 : index
    %35 = vector.load %arg2[%c0_11, %c0_12] : memref<4x1xf32, #tpu.memory_space<vmem>>, vector<4x1xf32>
    tpu.vector_store %arg2[%c0_11, %c0_12], %34 {strides = array<i32>} : memref<4x1xf32, #tpu.memory_space<vmem>>, vector<4x1xf32>,
    return
  }
  func.func @transform_0(%arg0: i32) -> (i32, i32) {
    %c0_i32 = arith.constant 0 : i32
    %c0_i32_0 = arith.constant 0 : i32
    %c0_i32_1 = arith.constant 0 : i32
    return %c0_i32, %c0_i32_0 : i32, i32
  }
  func.func @transform_1(%arg0: i32) -> (i32, i32) {
    %c0_i32 = arith.constant 0 : i32
    %c0_i32_0 = arith.constant 0 : i32
    %c0_i32_1 = arith.constant 0 : i32
    return %c0_i32, %c0_i32_0 : i32, i32
  }
}

</mosaic_0001>

<bundles_post_ra>
// kernel: tpu_custom_call.1
= control target key start
LH: loop header
LB: loop body
LE: loop exit
PB: predicated region body
PF: predicated region fallthrough
CT: control target
= control target key end

     0   :  { %6 = vsyncpa [#allocation3], 0  ;;  %s79_s9 = smov [#allocation2]   ;;  %s97_s0 = inlined_call_operand.hbm [shape: s32[4,64], index: 0, kind: input, shape index: {}]   ;;  %s98_s1 = inlined_call_operand.vmem [shape: f32[4,1], index: 1, kind: output, shape index: {}]  }
   0x1   :  { %s12_s8 = sshll.u32 %s97_s0, 4  ;;  %s14_s10 = sshll.u32 %s79_s9, 4  ;;  %s13_s8 = int_to_ptr.hbm [resolvable:$true] %s12_s8  ;;  %s15_s10 = int_to_ptr.vmem [resolvable:$true] %s14_s10 }
   0x2   :  { %17 = dma.hbm_to_vmem [thread:$0]  %s13_s8, 64, %s15_s10, [#allocation3]  }
   0x3   :  { %77 = dma.done.wait [#allocation3], 64  }
   0x4   :  { %78 = vsyncadd [#allocation3], 4294967232  ;;  %v22_v0 = vld [vmem:[#allocation2] sm:$0xf]  ;;  %v80_v3 = vmov 0.0   ;;  %vm40_vm7 = vcmask 519168  }
   0x5   :  { %v24_v1 = vsub.s32 0, %v22_v0  ;;  %vm23_vm0 = vcmp.lt.s32.totalorder %v22_v0, 0  ;;  %vm36_vm4 = vcmp.gt.s32.totalorder %v22_v0, 0  ;;  %vm44_vm8 = vcmask 3072  }
   0x6   :  { %v37_v4 = vsel %vm23_vm0, -1.0, %v80_v3 }
   0x7   :  { %v25_v2 = vsel %vm23_vm0, %v24_v1, %v22_v0  ;;  %v38_v8 = vsel %vm36_vm4, 1.0, %v37_v4 }
   0x8   :  { %vm29_vm1 = vcmp.eq.s32.totalorder %v25_v2, 4  ;;  %vm28_vm2 = vcmp.eq.s32.totalorder %v25_v2, 3  ;;  %vm30_vm3 = vcmp.eq.s32.totalorder %v25_v2, 5  ;;  %vm27_vm5 = vcmp.eq.s32.totalorder %v25_v2, 2 }
   0x9   :  { %v31_v5 = vsel %vm30_vm3, 9.0, %v80_v3  ;;  %vm26_vm6 = vcmp.eq.s32.totalorder %v25_v2, 1 }
   0xa   :  { %v32_v6 = vsel %vm29_vm1, 5.0, %v31_v5 }
   0xb   :  { %v33_v7 = vsel %vm28_vm2, 3.0, %v32_v6 }
   0xc   :  { %v34_v9 = vsel %vm27_vm5, 3.0, %v33_v7 }
   0xd   :  { %v35_v10 = vsel %vm26_vm6, 1.0, %v34_v9 }
   0xe   :  { %v39_v11 = vmul.f32 %v38_v8, %v35_v10 }
  0x10   :  { %v41_v12 = vsel %vm40_vm7, %v39_v11, 0.0 }
  0x11   :  { %42 = vadd.xlane.f32.xlu0 %v41_v12 }
  0x84   :  { %v43_v13 = vpop.xlane.xlu0 %42 }
  0x85   :  { %45 = vst.msk [vmem:[%s98_s1] sm:$0xf] %vm44_vm8, %v43_v13 }
  0x86   :  { %50 = vsyncpa [#allocation3], 1 }

</bundles_post_ra>
